<compile_context>
chip_gen: v5e
topology: v5e:2x2
jax: 0.10.0
libtpu: 0.0.40
codegen_flags: <defaults>
</compile_context>

<pallas_src>
import jax
import jax.numpy as jnp
from jax.experimental import pallas as pl
from jax.experimental.pallas import tpu as pltpu


LANE = 128      # lane width: every feature dim is padded to a multiple of this
TILE_M = 128    # batch rows per grid step (fills the MXU M dimension)


def _round_up(n, m):
    return (n + m - 1) // m * m


def _mlp_kernel(x_ref, w1_ref, b1_ref, w2_ref, b2_ref, w3_ref, b3_ref, o_ref):
    # Layer 1: (TILE_M, Kp) @ (Kp, Hp) on the MXU, f32 accumulation.
    h = jnp.dot(x_ref[...], w1_ref[...], preferred_element_type=jnp.float32)
    # f32 epilogue (bias + ReLU) on the accumulator, then bf16 for the next MXU pass.
    h = jnp.maximum(h + b1_ref[...], 0.0).astype(jnp.bfloat16)
    # Layer 2: (TILE_M, Hp) @ (Hp, Hp)
    h = jnp.dot(h, w2_ref[...], preferred_element_type=jnp.float32)
    h = jnp.maximum(h + b2_ref[...], 0.0).astype(jnp.bfloat16)
    # Layer 3 (no activation): (TILE_M, Hp) @ (Hp, Cp)
    out = jnp.dot(h, w3_ref[...], preferred_element_type=jnp.float32)
    o_ref[...] = (out + b3_ref[...]).astype(o_ref.dtype)


def prepare_params(params, compute_dtype=jnp.bfloat16):
    """One-time parameter prep (do NOT redo per forward call):
       - transpose PyTorch (out, in) weights to (in, out) for x @ W,
       - zero-pad every feature dim to a multiple of 128 lanes,
       - cast weights to bf16 for the MXU; keep biases f32 for the VPU epilogue."""
    w1, b1 = params["w1"], params["b1"]
    w2, b2 = params["w2"], params["b2"]
    w3, b3 = params["w3"], params["b3"]

    input_size = w1.shape[1]
    hidden = w1.shape[0]
    num_classes = w3.shape[0]

    kp = _round_up(input_size, LANE)
    hp = _round_up(hidden, LANE)
    cp = _round_up(num_classes, LANE)

    def pad_w(w_t, in_p, out_p):  # w_t is (in, out)
        return jnp.pad(w_t, ((0, in_p - w_t.shape[0]), (0, out_p - w_t.shape[1])))

    def pad_b(b, out_p):
        return jnp.pad(b, (0, out_p - b.shape[0])).reshape(1, out_p)

    return {
        "w1": pad_w(w1.T, kp, hp).astype(compute_dtype),
        "w2": pad_w(w2.T, hp, hp).astype(compute_dtype),
        "w3": pad_w(w3.T, hp, cp).astype(compute_dtype),
        "b1": pad_b(b1, hp).astype(jnp.float32),
        "b2": pad_b(b2, hp).astype(jnp.float32),
        "b3": pad_b(b3, cp).astype(jnp.float32),
        "dims": (input_size, hidden, num_classes, kp, hp, cp),
        "compute_dtype": compute_dtype,
    }


def mlp_forward(x, prep):
    """x: (batch, input_size) f32; prep: output of prepare_params."""
    input_size, hidden, num_classes, kp, hp, cp = prep["dims"]
    batch = x.shape[0]
    bp = _round_up(batch, TILE_M)

    # Zero-pad batch and feature dims (zeros are inert through matmul/ReLU), cast to bf16.
    xp = jnp.pad(x, ((0, bp - batch), (0, kp - input_size))).astype(prep["compute_dtype"])

    n_tiles = bp // TILE_M
    const2 = lambda i: (0, 0)  # weights/biases: same block every step -> stay resident in VMEM

    out_padded = pl.pallas_call(
        _mlp_kernel,
        out_shape=jax.ShapeDtypeStruct((bp, cp), jnp.float32),
        grid=(n_tiles,),
        in_specs=[
            pl.BlockSpec((TILE_M, kp), lambda i: (i, 0)),  # activations: tiled over batch
            pl.BlockSpec((kp, hp), const2),                # W1
            pl.BlockSpec((1, hp), const2),                 # b1
            pl.BlockSpec((hp, hp), const2),                # W2
            pl.BlockSpec((1, hp), const2),                 # b2
            pl.BlockSpec((hp, cp), const2),                # W3
            pl.BlockSpec((1, cp), const2),                 # b3
        ],
        out_specs=pl.BlockSpec((TILE_M, cp), lambda i: (i, 0)),
        compiler_params=pltpu.CompilerParams(
            dimension_semantics=("parallel",),             # shard batch tiles across TCs (v7x)
            vmem_limit_bytes=64 * 1024 * 1024,
        ),
    )(xp, prep["w1"], prep["b1"], prep["w2"], prep["b2"], prep["w3"], prep["b3"])

    # Strip batch / class padding.
    return out_padded[:batch, :num_classes]


def init_params(key, input_size, hidden_size, num_classes):
    """Deterministic init mimicking nn.Linear's uniform(-1/sqrt(fan_in), 1/sqrt(fan_in))."""
    ks = jax.random.split(key, 6)

    def linear(kw, kb, fan_in, fan_out):
        bound = 1.0 / jnp.sqrt(fan_in)
        w = jax.random.uniform(kw, (fan_out, fan_in), jnp.float32, -bound, bound)
        b = jax.random.uniform(kb, (fan_out,), jnp.float32, -bound, bound)
        return w, b

    w1, b1 = linear(ks[0], ks[1], input_size, hidden_size)
    w2, b2 = linear(ks[2], ks[3], hidden_size, hidden_size)
    w3, b3 = linear(ks[4], ks[5], hidden_size, num_classes)
    return {"w1": w1, "b1": b1, "w2": w2, "b2": b2, "w3": w3, "b3": b3}


def reference_forward(x, p, compute_dtype=jnp.bfloat16):
    """Reference with the same numerics as the kernel (bf16 operands, f32 accumulation)."""
    def lin(a, w, b):
        return jnp.dot(a.astype(compute_dtype), w.T.astype(compute_dtype),
                       preferred_element_type=jnp.float32) + b
    h = jnp.maximum(lin(x, p["w1"], p["b1"]), 0.0)
    h = jnp.maximum(lin(h, p["w2"], p["b2"]), 0.0)
    return lin(h, p["w3"], p["b3"])


if __name__ == "__main__":
    key = jax.random.PRNGKey(0)
    kx, kparam = jax.random.split(key)

    batch, input_size, hidden_size, num_classes = 8, 32, 64, 16
    x = jax.random.normal(kx, (batch, input_size), jnp.float32)
    params = init_params(kparam, input_size, hidden_size, num_classes)

    prep = prepare_params(params)           # one-time: transpose + pad + bf16 cast
    out = jax.block_until_ready(mlp_forward(x, prep))

    ref = reference_forward(x, params)
    assert out.shape == (batch, num_classes)
    assert jnp.allclose(out, ref, atol=1e-3, rtol=1e-3), "mismatch vs reference"
    print("KERNEL_OK")
</pallas_src>

<mosaic_0001>
module attributes {stable_mosaic.version = 11 : i64} {
  func.func @_mlp_kernel(%arg0: i32, %arg1: memref<128x128xbf16, #tpu.memory_space<vmem>>, %arg2: memref<128x128xbf16, #tpu.memory_space<vmem>>, %arg3: memref<1x128xf32, #tpu.memory_space<vmem>>, %arg4: memref<128x128xbf16, #tpu.memory_space<vmem>>, %arg5: memref<1x128xf32, #tpu.memory_space<vmem>>, %arg6: memref<128x128xbf16, #tpu.memory_space<vmem>>, %arg7: memref<1x128xf32, #tpu.memory_space<vmem>>, %arg8: memref<128x128xf32, #tpu.memory_space<vmem>>) attributes {dimension_semantics = [#tpu.dimension_semantics<parallel>], iteration_bounds = array<i64: 1>, scalar_prefetch = 0 : i64, scratch_operands = 0 : i64, tpu.core_type = #tpu.core_type<tc>, window_params = [{transform_indices = @transform_0, window_bounds = array<i64: 128, 128>}, {pipeline_mode = #tpu.pipeline_mode<synchronous>, transform_indices = @transform_1, window_bounds = array<i64: 128, 128>}, {pipeline_mode = #tpu.pipeline_mode<synchronous>, transform_indices = @transform_2, window_bounds = array<i64: 1, 128>}, {pipeline_mode = #tpu.pipeline_mode<synchronous>, transform_indices = @transform_3, window_bounds = array<i64: 128, 128>}, {pipeline_mode = #tpu.pipeline_mode<synchronous>, transform_indices = @transform_4, window_bounds = array<i64: 1, 128>}, {pipeline_mode = #tpu.pipeline_mode<synchronous>, transform_indices = @transform_5, window_bounds = array<i64: 128, 128>}, {pipeline_mode = #tpu.pipeline_mode<synchronous>, transform_indices = @transform_6, window_bounds = array<i64: 1, 128>}, {transform_indices = @transform_7, window_bounds = array<i64: 128, 128>}]} {
    %c0 = arith.constant 0 : index
    %c0_0 = arith.constant 0 : index
    %0 = vector.load %arg1[%c0, %c0_0] : memref<128x128xbf16, #tpu.memory_space<vmem>>, vector<128x128xbf16>
    %c0_1 = arith.constant 0 : index
    %c0_2 = arith.constant 0 : index
    %1 = vector.load %arg2[%c0_1, %c0_2] : memref<128x128xbf16, #tpu.memory_space<vmem>>, vector<128x128xbf16>
    %cst = arith.constant dense<0.000000e+00> : vector<128x128xf32>
    %2 = tpu.matmul %0, %1, %cst {dimension_numbers = #tpu.dot_dimension_numbers<[1], [0], [0], [1], [0, 0, 1, 1], [], []>} : vector<128x128xbf16>, vector<128x128xbf16>, vector<128x128xf32> -> vector<128x128xf32>
    %c0_3 = arith.constant 0 : index
    %c0_4 = arith.constant 0 : index
    %3 = vector.load %arg3[%c0_3, %c0_4] : memref<1x128xf32, #tpu.memory_space<vmem>>, vector<1x128xf32>
    %4 = vector.broadcast %3 : vector<1x128xf32> to vector<128x128xf32>
    %5 = arith.addf %2, %4 : vector<128x128xf32>
    %cst_5 = arith.constant 0.000000e+00 : f32
    %6 = vector.broadcast %cst_5 : f32 to vector<128x128xf32>
    %7 = arith.maximumf %5, %6 : vector<128x128xf32>
    %8 = arith.truncf %7 : vector<128x128xf32> to vector<128x128xbf16>
    %c0_6 = arith.constant 0 : index
    %c0_7 = arith.constant 0 : index
    %9 = vector.load %arg4[%c0_6, %c0_7] : memref<128x128xbf16, #tpu.memory_space<vmem>>, vector<128x128xbf16>
    %cst_8 = arith.constant dense<0.000000e+00> : vector<128x128xf32>
    %10 = tpu.matmul %8, %9, %cst_8 {dimension_numbers = #tpu.dot_dimension_numbers<[1], [0], [0], [1], [0, 0, 1, 1], [], []>} : vector<128x128xbf16>, vector<128x128xbf16>, vector<128x128xf32> -> vector<128x128xf32>
    %c0_9 = arith.constant 0 : index
    %c0_10 = arith.constant 0 : index
    %11 = vector.load %arg5[%c0_9, %c0_10] : memref<1x128xf32, #tpu.memory_space<vmem>>, vector<1x128xf32>
    %12 = vector.broadcast %11 : vector<1x128xf32> to vector<128x128xf32>
    %13 = arith.addf %10, %12 : vector<128x128xf32>
    %cst_11 = arith.constant 0.000000e+00 : f32
    %14 = vector.broadcast %cst_11 : f32 to vector<128x128xf32>
    %15 = arith.maximumf %13, %14 : vector<128x128xf32>
    %16 = arith.truncf %15 : vector<128x128xf32> to vector<128x128xbf16>
    %c0_12 = arith.constant 0 : index
    %c0_13 = arith.constant 0 : index
    %17 = vector.load %arg6[%c0_12, %c0_13] : memref<128x128xbf16, #tpu.memory_space<vmem>>, vector<128x128xbf16>
    %cst_14 = arith.constant dense<0.000000e+00> : vector<128x128xf32>
    %18 = tpu.matmul %16, %17, %cst_14 {dimension_numbers = #tpu.dot_dimension_numbers<[1], [0], [0], [1], [0, 0, 1, 1], [], []>} : vector<128x128xbf16>, vector<128x128xbf16>, vector<128x128xf32> -> vector<128x128xf32>
    %c0_15 = arith.constant 0 : index
    %c0_16 = arith.constant 0 : index
    %19 = vector.load %arg7[%c0_15, %c0_16] : memref<1x128xf32, #tpu.memory_space<vmem>>, vector<1x128xf32>
    %20 = vector.broadcast %19 : vector<1x128xf32> to vector<128x128xf32>
    %21 = arith.addf %18, %20 : vector<128x128xf32>
    %c0_17 = arith.constant 0 : index
    %c0_18 = arith.constant 0 : index
    %22 = vector.load %arg8[%c0_17, %c0_18] : memref<128x128xf32, #tpu.memory_space<vmem>>, vector<128x128xf32>
    tpu.vector_store %arg8[%c0_17, %c0_18], %21 {strides = array<i32>} : memref<128x128xf32, #tpu.memory_space<vmem>>, vector<128x128xf32>,
    return
  }
  func.func @transform_0(%arg0: i32) -> (i32, i32) {
    %c0_i32 = arith.constant 0 : i32
    %c0_i32_0 = arith.constant 0 : i32
    return %arg0, %c0_i32 : i32, i32
  }
  func.func @transform_1(%arg0: i32) -> (i32, i32) {
    %c0_i32 = arith.constant 0 : i32
    %c0_i32_0 = arith.constant 0 : i32
    %c0_i32_1 = arith.constant 0 : i32
    return %c0_i32, %c0_i32_0 : i32, i32
  }
  func.func @transform_2(%arg0: i32) -> (i32, i32) {
    %c0_i32 = arith.constant 0 : i32
    %c0_i32_0 = arith.constant 0 : i32
    %c0_i32_1 = arith.constant 0 : i32
    return %c0_i32, %c0_i32_0 : i32, i32
  }
  func.func @transform_3(%arg0: i32) -> (i32, i32) {
    %c0_i32 = arith.constant 0 : i32
    %c0_i32_0 = arith.constant 0 : i32
    %c0_i32_1 = arith.constant 0 : i32
    return %c0_i32, %c0_i32_0 : i32, i32
  }
  func.func @transform_4(%arg0: i32) -> (i32, i32) {
    %c0_i32 = arith.constant 0 : i32
    %c0_i32_0 = arith.constant 0 : i32
    %c0_i32_1 = arith.constant 0 : i32
    return %c0_i32, %c0_i32_0 : i32, i32
  }
  func.func @transform_5(%arg0: i32) -> (i32, i32) {
    %c0_i32 = arith.constant 0 : i32
    %c0_i32_0 = arith.constant 0 : i32
    %c0_i32_1 = arith.constant 0 : i32
    return %c0_i32, %c0_i32_0 : i32, i32
  }
  func.func @transform_6(%arg0: i32) -> (i32, i32) {
    %c0_i32 = arith.constant 0 : i32
    %c0_i32_0 = arith.constant 0 : i32
    %c0_i32_1 = arith.constant 0 : i32
    return %c0_i32, %c0_i32_0 : i32, i32
  }
  func.func @transform_7(%arg0: i32) -> (i32, i32) {
    %c0_i32 = arith.constant 0 : i32
    %c0_i32_0 = arith.constant 0 : i32
    return %arg0, %c0_i32 : i32, i32
  }
}

</mosaic_0001>

<bundles_post_ra>
// kernel: tpu_custom_call.1
= control target key start
LH: loop header
LB: loop body
LE: loop exit
PB: predicated region body
PF: predicated region fallthrough
CT: control target
= control target key end

     0   :  { %12 = vsyncpa [#allocation3], 0  ;;  %s1005_s0 = inlined_call_operand.hbm [shape: bf16[128,128], index: 0, kind: input, shape index: {}]   ;;  %s1006_s1 = inlined_call_operand.hbm [shape: bf16[128,128], index: 1, kind: input, shape index: {}]   ;;  %s1007_s2 = inlined_call_operand.vmem [shape: f32[1,128], index: 2, kind: input, shape index: {}]   ;;  %s1008_s3 = inlined_call_operand.hbm [shape: bf16[128,128], index: 3, kind: input, shape index: {}]   ;;  %s1009_s4 = inlined_call_operand.vmem [shape: f32[1,128], index: 4, kind: input, shape index: {}]   ;;  %s1010_s5 = inlined_call_operand.hbm [shape: bf16[128,128], index: 5, kind: input, shape index: {}]   ;;  %s1011_s6 = inlined_call_operand.vmem [shape: f32[1,128], index: 6, kind: input, shape index: {}]   ;;  %s1012_s7 = inlined_call_operand.hbm [shape: f32[128,128], index: 7, kind: output, shape index: {}]  }
   0x1   :  { %13 = vsyncpa [#allocation6], 0 }
   0x2   :  { %14 = vsyncpa [#allocation9], 0 }
   0x3   :  { %15 = vsyncpa [#allocation4], 0  ;;  %s33_s26 = sshll.u32 %s1006_s1, 4  ;;  %s914_s27 = smov [#allocation5]   ;;  %s34_s26 = int_to_ptr.hbm [resolvable:$true] %s33_s26 }
   0x4   :  { %s35_s28 = sshll.u32 %s914_s27, 4  ;;  %s20_s8 = sshll.u32 %s1005_s0, 4  ;;  %s36_s28 = int_to_ptr.vmem [resolvable:$true] %s35_s28  ;;  %s21_s8 = int_to_ptr.hbm [resolvable:$true] %s20_s8 }
   0x5   :  { %s915_s9 = smov 64   ;;  %s916_s10 = smov 4  }
   0x6   :  { %41 = dma.hbm_to_vmem [thread:$0]  %s34_s26, 1024, %s36_s28, [#allocation6], %s915_s9, %s915_s9, %s916_s10  }
   0x7   :  { %s917_s11 = smov [#allocation2]   ;;  %s48_s15 = sshll.u32 %s1008_s3, 4  ;;  %s49_s15 = int_to_ptr.hbm [resolvable:$true] %s48_s15 }
   0x8   :  { %s22_s12 = sshll.u32 %s917_s11, 4  ;;  %s63_s17 = sshll.u32 %s1010_s5, 4  ;;  %s23_s12 = int_to_ptr.vmem [resolvable:$true] %s22_s12  ;;  %s64_s17 = int_to_ptr.hbm [resolvable:$true] %s63_s17 }
   0x9   :  { %28 = dma.hbm_to_vmem [thread:$0]  %s21_s8, 1024, %s23_s12, [#allocation3], %s915_s9, %s915_s9, %s916_s10  }
   0xa   :  { %s918_s18 = smov [#allocation7]   ;;  %s919_s0 = smov [#allocation8]  }
   0xb   :  { %s50_s19 = sshll.u32 %s918_s18, 4  ;;  %s65_s20 = sshll.u32 %s919_s0, 4  ;;  %s51_s19 = int_to_ptr.vmem [resolvable:$true] %s50_s19  ;;  %s66_s20 = int_to_ptr.vmem [resolvable:$true] %s65_s20 }
   0xc   :  { %56 = dma.hbm_to_vmem [thread:$0]  %s49_s15, 1024, %s51_s19, [#allocation6], %s915_s9, %s915_s9, %s916_s10  }
   0xd   :  { %71 = dma.hbm_to_vmem [thread:$0]  %s64_s17, 1024, %s66_s20, [#allocation9], %s915_s9, %s915_s9, %s916_s10  }
   0xe   :  { %906 = dma.done.wait [#allocation3], 1024  }
   0xf   :  { %907 = vsyncadd [#allocation3], 4294966272 }
  0x10   :  { %908 = dma.done.wait [#allocation6], 2048  }
  0x11   :  { %909 = vsyncadd [#allocation6], 4294965248 }
  0x12   :  { %910 = dma.done.wait [#allocation9], 1024  }
  0x13   :  { %911 = vsyncadd [#allocation9], 4294966272  ;;  %v733_v0 = vld [vmem:[#allocation5 + $0x38] sm:$0xff]  ;;  %v732_v1 = vld [vmem:[#allocation5 + $0x30] sm:$0xff]  ;;  %s575_s26 = sshll.u32 %s1012_s7, 4  ;;  %s921_s27 = smov 128   ;;  %s576_s26 = int_to_ptr.hbm [resolvable:$true] %s575_s26 }
  0x14   :  { %222 = vmatpush.bf16.msra.mxu0 %v733_v0  ;;  %750 = vmatpush.bf16.msra.mxu3 %v733_v0  ;;  %v731_v2 = vld [vmem:[#allocation5 + $0x28] sm:$0xff]  ;;  %v730_v3 = vld [vmem:[#allocation5 + $0x20] sm:$0xff]  ;;  %v729_v4 = vld [vmem:[#allocation5 + $0x18] sm:$0xff]  ;;  %s922_s28 = smov 8  }
  0x15   :  { %v728_v5 = vld [vmem:[#allocation5 + $0x10] sm:$0xff]  ;;  %v727_v6 = vld [vmem:[#allocation5 + $0x8] sm:$0xff]  ;;  %v726_v7 = vld [vmem:[#allocation5] sm:$0xff] }
  0x16   :  { %v718_v8 = vld [vmem:[#allocation2] sm:$0xff]  ;;  %v724_v9 = vld [vmem:[#allocation2 + $0x30] sm:$0xff]  ;;  %v719_v10 = vld [vmem:[#allocation2 + $0x8] sm:$0xff] }
  0x17   :  { %v725_v11 = vld [vmem:[#allocation2 + $0x38] sm:$0xff]  ;;  %v720_v12 = vld [vmem:[#allocation2 + $0x10] sm:$0xff]  ;;  %v739_v16 = vld [vmem:[#allocation7 + $0x28] sm:$0xff] }
  0x18   :  { %223 = vmatpush.bf16.msra.mxu0 %v732_v1  ;;  %751 = vmatpush.bf16.msra.mxu3 %v732_v1  ;;  %v721_v13 = vld [vmem:[#allocation2 + $0x18] sm:$0xff]  ;;  %v740_v15 = vld [vmem:[#allocation7 + $0x30] sm:$0xff]  ;;  %v738_v17 = vld [vmem:[#allocation7 + $0x20] sm:$0xff] }
  0x19   :  { %v741_v14 = vld [vmem:[#allocation7 + $0x38] sm:$0xff]  ;;  %v722_v18 = vld [vmem:[#allocation2 + $0x20] sm:$0xff]  ;;  %v723_v19 = vld [vmem:[#allocation2 + $0x28] sm:$0xff] }
  0x1a   :  { %363 = vmatpush.bf16.msra.mxu1 %v741_v14  ;;  %v737_v20 = vld [vmem:[#allocation7 + $0x18] sm:$0xff]  ;;  %v736_v21 = vld [vmem:[#allocation7 + $0x10] sm:$0xff]  ;;  %v735_v22 = vld [vmem:[#allocation7 + $0x8] sm:$0xff] }
  0x1b   :  { %v734_v23 = vld [vmem:[#allocation7] sm:$0xff] }
  0x1c   :  { %224 = vmatpush.bf16.msra.mxu0 %v731_v2  ;;  %752 = vmatpush.bf16.msra.mxu3 %v731_v2  ;;  %v978_v25 = vld [vmem:[%s1007_s2] ss:$0 sm:$0xff] }
  0x1e   :  { %364 = vmatpush.bf16.msra.mxu1 %v740_v15 }
  0x20   :  { %225 = vmatpush.bf16.msra.mxu0 %v730_v3  ;;  %753 = vmatpush.bf16.msra.mxu3 %v730_v3  ;;  %v749_v3 = vld [vmem:[#allocation8 + $0x38] sm:$0xff] }
  0x21   :  { %504 = vmatpush.bf16.msra.mxu2 %v749_v3 }
  0x22   :  { %365 = vmatpush.bf16.msra.mxu1 %v739_v16 }
  0x24   :  { %226 = vmatpush.bf16.msra.mxu0 %v729_v4  ;;  %754 = vmatpush.bf16.msra.mxu3 %v729_v4 }
  0x26   :  { %366 = vmatpush.bf16.msra.mxu1 %v738_v17 }
  0x28   :  { %227 = vmatpush.bf16.msra.mxu0 %v728_v5  ;;  %755 = vmatpush.bf16.msra.mxu3 %v728_v5  ;;  %v748_v5 = vld [vmem:[#allocation8 + $0x30] sm:$0xff] }
  0x29   :  { %505 = vmatpush.bf16.msra.mxu2 %v748_v5 }
  0x2a   :  { %367 = vmatpush.bf16.msra.mxu1 %v737_v20 }
  0x2c   :  { %228 = vmatpush.bf16.msra.mxu0 %v727_v6  ;;  %756 = vmatpush.bf16.msra.mxu3 %v727_v6  ;;  %v747_v6 = vld [vmem:[#allocation8 + $0x28] sm:$0xff] }
  0x2d   :  { %506 = vmatpush.bf16.msra.mxu2 %v747_v6 }
  0x2e   :  { %368 = vmatpush.bf16.msra.mxu1 %v736_v21 }
  0x30   :  { %229 = vmatpush.bf16.msra.mxu0 %v726_v7  ;;  %757 = vmatpush.bf16.msra.mxu3 %v726_v7 }
  0x32   :  { %369 = vmatpush.bf16.msra.mxu1 %v735_v22 }
  0x33   :  { %230 = vmatmul.bf16.vlgmr.msra.gmra.mxu0 %v718_v8  ;;  %260 = vmatmul.bf16.vlgmr.msra.gmra.mxu3 %v724_v9 }
  0x34   :  { %758 = vmatpush.bf16.msrb.mxu3 %v741_v14 }
  0x36   :  { %370 = vmatpush.bf16.msra.mxu1 %v734_v23 }
  0x38   :  { %759 = vmatpush.bf16.msrb.mxu3 %v740_v15 }
  0x3c   :  { %760 = vmatpush.bf16.msrb.mxu3 %v739_v16 }
  0x40   :  { %761 = vmatpush.bf16.msrb.mxu3 %v738_v17 }
  0x43   :  { %235 = vmatmul.bf16.gmra.mxu0 %v719_v10  ;;  %265 = vmatmul.bf16.gmra.mxu3 %v725_v11  ;;  %v746_v10 = vld [vmem:[#allocation8 + $0x20] sm:$0xff] }
  0x44   :  { %762 = vmatpush.bf16.msrb.mxu3 %v737_v20  ;;  %507 = vmatpush.bf16.msra.mxu2 %v746_v10 }
  0x48   :  { %763 = vmatpush.bf16.msrb.mxu3 %v736_v21  ;;  %v745_v21 = vld [vmem:[#allocation8 + $0x18] sm:$0xff] }
  0x49   :  { %508 = vmatpush.bf16.msra.mxu2 %v745_v21 }
  0x4c   :  { %764 = vmatpush.bf16.msrb.mxu3 %v735_v22  ;;  %v744_v22 = vld [vmem:[#allocation8 + $0x10] sm:$0xff] }
  0x4d   :  { %509 = vmatpush.bf16.msra.mxu2 %v744_v22 }
  0x50   :  { %765 = vmatpush.bf16.msrb.mxu3 %v734_v23  ;;  %v743_v23 = vld [vmem:[#allocation8 + $0x8] sm:$0xff] }
  0x51   :  { %510 = vmatpush.bf16.msra.mxu2 %v743_v23 }
  0x53   :  { %240 = vmatmul.bf16.gmra.mxu0 %v720_v12 }
  0x54   :  { %766 = vmatpush.bf16.msra.mxu3 %v749_v3 }
  0x58   :  { %767 = vmatpush.bf16.msra.mxu3 %v748_v5 }
  0x5c   :  { %768 = vmatpush.bf16.msra.mxu3 %v747_v6 }
  0x60   :  { %769 = vmatpush.bf16.msra.mxu3 %v746_v10 }
  0x63   :  { %245 = vmatmul.bf16.gmra.mxu0 %v721_v13 }
  0x64   :  { %770 = vmatpush.bf16.msra.mxu3 %v745_v21 }
  0x68   :  { %771 = vmatpush.bf16.msra.mxu3 %v744_v22 }
  0x6c   :  { %772 = vmatpush.bf16.msra.mxu3 %v743_v23 }
  0x73   :  { %250 = vmatmul.bf16.gmra.mxu0 %v722_v18 }
  0x83   :  { %255 = vmatmul.bf16.gmra.mxu0 %v723_v19 }
  0xb0   :  { %v231_v24 = vpop.f32.mrf.mxu0 }
  0xb1   :  { %v232_v27 = vadd.f32 %v978_v25, %v231_v24  ;;  %v742_v24 = vld [vmem:[#allocation8] sm:$0xff] }
  0xb2   :  { %511 = vmatpush.bf16.msra.mxu2 %v742_v24  ;;  %773 = vmatpush.bf16.msra.mxu3 %v742_v24 }
  0xb3   :  { %v271_v30 = vmax.f32 %v232_v27, 0.0 }
  0xb6   :  { %v261_v26 = vpop.f32.mrf.mxu3 }
  0xb7   :  { %v262_v32 = vadd.f32 %v978_v25, %v261_v26 }
  0xb8   :  { %v233_v28 = vpop.f32.mrf.mxu0 }
  0xb9   :  { %v234_v29 = vadd.f32 %v978_v25, %v233_v28  ;;  %v283_v35 = vmax.f32 %v262_v32, 0.0 }
  0xbb   :  { %v272_v31 = vmax.f32 %v234_v29, 0.0 }
  0xbd   :  { %v287_v33 = vpack.c.bf16 %v272_v31, %v271_v30 }
  0xbe   :  { %v263_v34 = vpop.f32.mrf.mxu3 }
  0xbf   :  { %371 = vmatmul.bf16.vlgmr.msra.gmra.mxu1 %v287_v33  ;;  %v264_v36 = vadd.f32 %v978_v25, %v263_v34 }
  0xc0   :  { %v236_v37 = vpop.f32.mrf.mxu0 }
  0xc1   :  { %v284_v38 = vmax.f32 %v264_v36, 0.0  ;;  %v237_v41 = vadd.f32 %v978_v25, %v236_v37 }
  0xc3   :  { %v293_v39 = vpack.c.bf16 %v284_v38, %v283_v35  ;;  %v273_v44 = vmax.f32 %v237_v41, 0.0 }
  0xc5   :  { %401 = vmatmul.bf16.vlgmr.msrb.gmra.mxu3 %v293_v39 }
  0xc6   :  { %v266_v40 = vpop.f32.mrf.mxu3 }
  0xc7   :  { %v267_v46 = vadd.f32 %v978_v25, %v266_v40 }
  0xc8   :  { %v238_v42 = vpop.f32.mrf.mxu0 }
  0xc9   :  { %v239_v43 = vadd.f32 %v978_v25, %v238_v42  ;;  %v285_v49 = vmax.f32 %v267_v46, 0.0 }
  0xcb   :  { %v274_v45 = vmax.f32 %v239_v43, 0.0 }
  0xcd   :  { %v288_v47 = vpack.c.bf16 %v274_v45, %v273_v44 }
  0xce   :  { %v268_v48 = vpop.f32.mrf.mxu3 }
  0xcf   :  { %376 = vmatmul.bf16.gmra.mxu1 %v288_v47  ;;  %v269_v50 = vadd.f32 %v978_v25, %v268_v48 }
  0xd0   :  { %v241_v51 = vpop.f32.mrf.mxu0 }
  0xd1   :  { %v286_v52 = vmax.f32 %v269_v50, 0.0  ;;  %v242_v54 = vadd.f32 %v978_v25, %v241_v51 }
  0xd3   :  { %v294_v53 = vpack.c.bf16 %v286_v52, %v285_v49  ;;  %v275_v57 = vmax.f32 %v242_v54, 0.0 }
  0xd5   :  { %406 = vmatmul.bf16.gmra.mxu3 %v294_v53 }
  0xd8   :  { %v243_v55 = vpop.f32.mrf.mxu0 }
  0xd9   :  { %v244_v56 = vadd.f32 %v978_v25, %v243_v55 }
  0xdb   :  { %v276_v58 = vmax.f32 %v244_v56, 0.0 }
  0xdd   :  { %v289_v59 = vpack.c.bf16 %v276_v58, %v275_v57 }
  0xdf   :  { %381 = vmatmul.bf16.gmra.mxu1 %v289_v59 }
  0xe0   :  { %v246_v60 = vpop.f32.mrf.mxu0 }
  0xe1   :  { %v247_v61 = vadd.f32 %v978_v25, %v246_v60 }
  0xe3   :  { %v277_v0 = vmax.f32 %v247_v61, 0.0 }
  0xe8   :  { %v248_v62 = vpop.f32.mrf.mxu0 }
  0xe9   :  { %v249_v63 = vadd.f32 %v978_v25, %v248_v62 }
  0xeb   :  { %v278_v1 = vmax.f32 %v249_v63, 0.0 }
  0xed   :  { %v290_v2 = vpack.c.bf16 %v278_v1, %v277_v0 }
  0xef   :  { %386 = vmatmul.bf16.gmra.mxu1 %v290_v2 }
  0xf0   :  { %v251_v4 = vpop.f32.mrf.mxu0 }
  0xf1   :  { %v252_v7 = vadd.f32 %v978_v25, %v251_v4 }
  0xf3   :  { %v279_v11 = vmax.f32 %v252_v7, 0.0 }
  0xf8   :  { %v253_v8 = vpop.f32.mrf.mxu0 }
  0xf9   :  { %v254_v9 = vadd.f32 %v978_v25, %v253_v8 }
  0xfb   :  { %v280_v12 = vmax.f32 %v254_v9, 0.0 }
  0xfd   :  { %v291_v13 = vpack.c.bf16 %v280_v12, %v279_v11 }
  0xff   :  { %391 = vmatmul.bf16.gmra.mxu1 %v291_v13 }
 0x100   :  { %v256_v14 = vpop.f32.mrf.mxu0 }
 0x101   :  { %v257_v15 = vadd.f32 %v978_v25, %v256_v14 }
 0x103   :  { %v281_v18 = vmax.f32 %v257_v15, 0.0 }
 0x108   :  { %v258_v16 = vpop.f32.mrf.mxu0 }
 0x109   :  { %v259_v17 = vadd.f32 %v978_v25, %v258_v16  ;;  %v784_v25 = vld [vmem:[%s1009_s4] ss:$0 sm:$0xff] }
 0x10b   :  { %v282_v19 = vmax.f32 %v259_v17, 0.0 }
 0x10d   :  { %v292_v20 = vpack.c.bf16 %v282_v19, %v281_v18  ;;  %v785_v18 = vld [vmem:[%s1011_s6] ss:$0 sm:$0xff]  ;;  %s920_s6 = smov [#allocation10]  }
 0x10e   :  { %s573_s23 = sshll.u32 %s920_s6, 4  ;;  %s574_s23 = int_to_ptr.vmem [resolvable:$true] %s573_s23 }
 0x10f   :  { %396 = vmatmul.bf16.gmra.mxu1 %v292_v20 }
 0x13c   :  { %v372_v26 = vpop.f32.mrf.mxu1 }
 0x13d   :  { %v373_v27 = vadd.f32 %v784_v25, %v372_v26 }
 0x13f   :  { %v412_v30 = vmax.f32 %v373_v27, 0.0 }
 0x144   :  { %v374_v28 = vpop.f32.mrf.mxu1 }
 0x145   :  { %v375_v29 = vadd.f32 %v784_v25, %v374_v28 }
 0x147   :  { %v413_v31 = vmax.f32 %v375_v29, 0.0 }
 0x148   :  { %v402_v32 = vpop.f32.mrf.mxu3 }
 0x149   :  { %v428_v33 = vpack.c.bf16 %v413_v31, %v412_v30  ;;  %v403_v35 = vadd.f32 %v784_v25, %v402_v32 }
 0x14b   :  { %512 = vmatmul.bf16.vlgmr.msra.gmra.mxu2 %v428_v33  ;;  %v424_v37 = vmax.f32 %v403_v35, 0.0 }
 0x14c   :  { %v377_v34 = vpop.f32.mrf.mxu1 }
 0x14d   :  { %v378_v39 = vadd.f32 %v784_v25, %v377_v34 }
 0x14f   :  { %v414_v44 = vmax.f32 %v378_v39, 0.0 }
 0x150   :  { %v404_v36 = vpop.f32.mrf.mxu3 }
 0x151   :  { %v405_v38 = vadd.f32 %v784_v25, %v404_v36 }
 0x153   :  { %v425_v40 = vmax.f32 %v405_v38, 0.0 }
 0x154   :  { %v379_v41 = vpop.f32.mrf.mxu1 }
 0x155   :  { %v380_v42 = vadd.f32 %v784_v25, %v379_v41  ;;  %v434_v43 = vpack.c.bf16 %v425_v40, %v424_v37 }
 0x157   :  { %v415_v45 = vmax.f32 %v380_v42, 0.0  ;;  %542 = vmatmul.bf16.vlgmr.msra.gmra.mxu3 %v434_v43 }
 0x158   :  { %v407_v46 = vpop.f32.mrf.mxu3 }
 0x159   :  { %v429_v47 = vpack.c.bf16 %v415_v45, %v414_v44  ;;  %v408_v49 = vadd.f32 %v784_v25, %v407_v46 }
 0x15b   :  { %517 = vmatmul.bf16.gmra.mxu2 %v429_v47  ;;  %v426_v51 = vmax.f32 %v408_v49, 0.0 }
 0x15c   :  { %v382_v48 = vpop.f32.mrf.mxu1 }
 0x15d   :  { %v383_v53 = vadd.f32 %v784_v25, %v382_v48 }
 0x15f   :  { %v416_v58 = vmax.f32 %v383_v53, 0.0 }
 0x160   :  { %v409_v50 = vpop.f32.mrf.mxu3 }
 0x161   :  { %v410_v52 = vadd.f32 %v784_v25, %v409_v50 }
 0x163   :  { %v427_v54 = vmax.f32 %v410_v52, 0.0 }
 0x164   :  { %v384_v55 = vpop.f32.mrf.mxu1 }
 0x165   :  { %v385_v56 = vadd.f32 %v784_v25, %v384_v55  ;;  %v435_v57 = vpack.c.bf16 %v427_v54, %v426_v51 }
 0x167   :  { %v417_v59 = vmax.f32 %v385_v56, 0.0  ;;  %547 = vmatmul.bf16.gmra.mxu3 %v435_v57 }
 0x169   :  { %v430_v60 = vpack.c.bf16 %v417_v59, %v416_v58 }
 0x16b   :  { %522 = vmatmul.bf16.gmra.mxu2 %v430_v60 }
 0x16c   :  { %v387_v61 = vpop.f32.mrf.mxu1 }
 0x16d   :  { %v388_v62 = vadd.f32 %v784_v25, %v387_v61 }
 0x16f   :  { %v418_v1 = vmax.f32 %v388_v62, 0.0 }
 0x174   :  { %v389_v63 = vpop.f32.mrf.mxu1 }
 0x175   :  { %v390_v0 = vadd.f32 %v784_v25, %v389_v63 }
 0x177   :  { %v419_v2 = vmax.f32 %v390_v0, 0.0 }
 0x179   :  { %v431_v3 = vpack.c.bf16 %v419_v2, %v418_v1 }
 0x17b   :  { %527 = vmatmul.bf16.gmra.mxu2 %v431_v3 }
 0x17c   :  { %v392_v4 = vpop.f32.mrf.mxu1 }
 0x17d   :  { %v393_v5 = vadd.f32 %v784_v25, %v392_v4 }
 0x17f   :  { %v420_v8 = vmax.f32 %v393_v5, 0.0 }
 0x184   :  { %v394_v6 = vpop.f32.mrf.mxu1 }
 0x185   :  { %v395_v7 = vadd.f32 %v784_v25, %v394_v6 }
 0x187   :  { %v421_v9 = vmax.f32 %v395_v7, 0.0 }
 0x189   :  { %v432_v10 = vpack.c.bf16 %v421_v9, %v420_v8 }
 0x18b   :  { %532 = vmatmul.bf16.gmra.mxu2 %v432_v10 }
 0x18c   :  { %v397_v11 = vpop.f32.mrf.mxu1 }
 0x18d   :  { %v398_v12 = vadd.f32 %v784_v25, %v397_v11 }
 0x18f   :  { %v422_v15 = vmax.f32 %v398_v12, 0.0 }
 0x194   :  { %v399_v13 = vpop.f32.mrf.mxu1 }
 0x195   :  { %v400_v14 = vadd.f32 %v784_v25, %v399_v13 }
 0x197   :  { %v423_v16 = vmax.f32 %v400_v14, 0.0 }
 0x199   :  { %v433_v17 = vpack.c.bf16 %v423_v16, %v422_v15 }
 0x19b   :  { %537 = vmatmul.bf16.gmra.mxu2 %v433_v17 }
 0x1ce   :  { %v513_v19 = vpop.f32.mrf.mxu2 }
 0x1cf   :  { %v514_v20 = vadd.f32 %v785_v18, %v513_v19 }
 0x1d1   :  { %553 = vst [vmem:[#allocation10] sm:$0xff] %v514_v20 }
 0x1d6   :  { %v515_v21 = vpop.f32.mrf.mxu2 }
 0x1d7   :  { %v516_v22 = vadd.f32 %v785_v18, %v515_v21 }
 0x1d9   :  { %554 = vst [vmem:[#allocation10 + $0x8] sm:$0xff] %v516_v22 }
 0x1da   :  { %v543_v23 = vpop.f32.mrf.mxu3 }
 0x1db   :  { %v544_v24 = vadd.f32 %v785_v18, %v543_v23 }
 0x1dd   :  { %565 = vst [vmem:[#allocation10 + $0x60] sm:$0xff] %v544_v24 }
 0x1de   :  { %v518_v26 = vpop.f32.mrf.mxu2 }
 0x1df   :  { %v519_v27 = vadd.f32 %v785_v18, %v518_v26 }
 0x1e1   :  { %555 = vst [vmem:[#allocation10 + $0x10] sm:$0xff] %v519_v27 }
 0x1e2   :  { %v545_v25 = vpop.f32.mrf.mxu3 }
 0x1e3   :  { %v546_v28 = vadd.f32 %v785_v18, %v545_v25 }
 0x1e5   :  { %566 = vst [vmem:[#allocation10 + $0x68] sm:$0xff] %v546_v28 }
 0x1e6   :  { %v520_v29 = vpop.f32.mrf.mxu2 }
 0x1e7   :  { %v521_v30 = vadd.f32 %v785_v18, %v520_v29 }
 0x1e9   :  { %556 = vst [vmem:[#allocation10 + $0x18] sm:$0xff] %v521_v30 }
 0x1ea   :  { %v548_v31 = vpop.f32.mrf.mxu3 }
 0x1eb   :  { %v549_v32 = vadd.f32 %v785_v18, %v548_v31 }
 0x1ed   :  { %567 = vst [vmem:[#allocation10 + $0x70] sm:$0xff] %v549_v32 }
 0x1ee   :  { %v523_v33 = vpop.f32.mrf.mxu2 }
 0x1ef   :  { %v524_v34 = vadd.f32 %v785_v18, %v523_v33 }
 0x1f1   :  { %557 = vst [vmem:[#allocation10 + $0x20] sm:$0xff] %v524_v34 }
 0x1f2   :  { %v550_v35 = vpop.f32.mrf.mxu3 }
 0x1f3   :  { %v551_v36 = vadd.f32 %v785_v18, %v550_v35 }
 0x1f5   :  { %568 = vst [vmem:[#allocation10 + $0x78] sm:$0xff] %v551_v36 }
 0x1f6   :  { %v525_v37 = vpop.f32.mrf.mxu2 }
 0x1f7   :  { %v526_v38 = vadd.f32 %v785_v18, %v525_v37 }
 0x1f9   :  { %558 = vst [vmem:[#allocation10 + $0x28] sm:$0xff] %v526_v38 }
 0x1fe   :  { %v528_v39 = vpop.f32.mrf.mxu2 }
 0x1ff   :  { %v529_v40 = vadd.f32 %v785_v18, %v528_v39 }
 0x201   :  { %559 = vst [vmem:[#allocation10 + $0x30] sm:$0xff] %v529_v40 }
 0x206   :  { %v530_v41 = vpop.f32.mrf.mxu2 }
 0x207   :  { %v531_v42 = vadd.f32 %v785_v18, %v530_v41 }
 0x209   :  { %560 = vst [vmem:[#allocation10 + $0x38] sm:$0xff] %v531_v42 }
 0x20e   :  { %v533_v43 = vpop.f32.mrf.mxu2 }
 0x20f   :  { %v534_v44 = vadd.f32 %v785_v18, %v533_v43 }
 0x211   :  { %561 = vst [vmem:[#allocation10 + $0x40] sm:$0xff] %v534_v44 }
 0x216   :  { %v535_v45 = vpop.f32.mrf.mxu2 }
 0x217   :  { %v536_v46 = vadd.f32 %v785_v18, %v535_v45 }
 0x219   :  { %562 = vst [vmem:[#allocation10 + $0x48] sm:$0xff] %v536_v46 }
 0x21e   :  { %v538_v47 = vpop.f32.mrf.mxu2 }
 0x21f   :  { %v539_v48 = vadd.f32 %v785_v18, %v538_v47 }
 0x221   :  { %563 = vst [vmem:[#allocation10 + $0x50] sm:$0xff] %v539_v48 }
 0x226   :  { %v540_v49 = vpop.f32.mrf.mxu2 }
 0x227   :  { %v541_v50 = vadd.f32 %v785_v18, %v540_v49 }
 0x229   :  { %564 = vst [vmem:[#allocation10 + $0x58] sm:$0xff] %v541_v50 }
 0x22a   :  { %581 = dma.vmem_to_hbm [thread:$0]  %s574_s23, 2048, %s576_s26, [#allocation4], %s921_s27, %s921_s27, %s922_s28  }
 0x22b   :  { %912 = dma.done.wait [#allocation4], 2048  }
 0x22c   :  { %913 = vsyncadd [#allocation4], 4294965248 }
 0x22d   :  { %586 = vsyncpa [#allocation3], 1 }
 0x22e   :  { %587 = vsyncpa [#allocation6], 1 }
 0x22f   :  { %588 = vsyncpa [#allocation9], 1 }
 0x230   :  { %589 = vsyncpa [#allocation4], 1 }

</bundles_post_ra>
